<compile_context>
chip_gen: v7x
topology: tpu7x:2x2x1
jax: 0.10.0
libtpu: 0.0.40
codegen_flags: <defaults>
</compile_context>

<pallas_src>
import jax
import jax.numpy as jnp
from jax import lax
from jax.experimental import pallas as pl
from jax.experimental.pallas import tpu as pltpu

# Problem sizes (small, consistent with the module)
N, C_IN, C_OUT, H, W = 2, 4, 8, 16, 16
KH = KW = 3
HW = H * W                 # 256 lanes per image
NHW = N * HW               # 512 lanes total (batch folded into lanes)
C_PAD = 8                  # C_IN zero-padded to a full f32 sublane group
K1 = KH * KW * C_PAD       # 72 -> conv1 contraction dim
K2 = KH * KW * C_OUT       # 72 -> conv2 contraction dim


def doubleconv_kernel(x_ref, m_ref, w1_ref, w2_ref, b1_ref, b2_ref,
                      o_ref, stack_ref):
    # x_ref   : (C_PAD, NHW)   f32  -- input, channels padded, batch in lanes
    # m_ref   : (9, NHW)       f32  -- per-tap border/seam masks (1.0 / 0.0)
    # w1_ref  : (C_OUT, K1)    bf16 -- conv1 weights, BN1 scale folded
    # w2_ref  : (C_OUT, K2)    bf16 -- conv2 weights, BN2 scale folded
    # b1_ref  : (C_OUT, 1)     f32  -- folded BN1 bias
    # b2_ref  : (C_OUT, 1)     f32  -- folded BN2 bias
    # o_ref   : (C_OUT, NHW)   f32  -- lane-dense output slab
    # stack_ref: (9*C_PAD, NHW) f32 -- im2col scratch, reused by both convs

    def build_stack(x):
        # x: (8, NHW) f32.  Writes the 9 shifted+masked taps as aligned
        # 8-sublane slabs, returns the whole stack cast to bf16 for the MXU.
        for t in range(KH * KW):
            dy = t // KW - 1
            dx = t % KW - 1
            offset = dy * W + dx            # source pixel = p + offset
            if offset == 0:
                tap = x                     # center tap: no shift, no mask
            else:
                shifted = pltpu.roll(x, shift=(-offset) % NHW, axis=1)
                tap = shifted * m_ref[pl.ds(t, 1), :]   # kill border/seam wrap
            stack_ref[pl.ds(t * C_PAD, C_PAD), :] = tap
        return stack_ref[...].astype(jnp.bfloat16)

    x = x_ref[...]                                              # (8, NHW) f32

    # Conv1 + BN1 + ReLU: one stacked-K MXU matmul, bias+ReLU on VPU.
    y = jnp.dot(w1_ref[...], build_stack(x),
                preferred_element_type=jnp.float32)             # (C_OUT, NHW)
    y = jnp.maximum(y + b1_ref[...], 0.0)

    # Conv2 + BN2 + ReLU.
    z = jnp.dot(w2_ref[...], build_stack(y),
                preferred_element_type=jnp.float32)             # (C_OUT, NHW)
    z = jnp.maximum(z + b2_ref[...], 0.0)

    o_ref[...] = z                                              # lane-dense store


def _pack_weights(w, scale, c_in, c_pad):
    """(C_OUT, c_in, 3, 3) OIHW -> (C_OUT, 9*c_pad) bf16, BN scale folded.

    Column layout matches the kernel's im2col stack: col = t*c_pad + c,
    t = kh*3 + kw.
    """
    wt = jnp.transpose(w, (0, 2, 3, 1)).reshape(C_OUT, KH * KW, c_in)
    if c_pad > c_in:
        wt = jnp.pad(wt, ((0, 0), (0, 0), (0, c_pad - c_in)))
    wt = wt * scale[:, None, None]
    return wt.reshape(C_OUT, KH * KW * c_pad).astype(jnp.bfloat16)


def _make_masks():
    """(9, NHW) f32 validity masks for each tap (precomputed host-side).

    row/col are derived from lane % HW so the masks are per-image, which also
    kills cross-image wraparound introduced by rolling the flattened lane axis.
    """
    lane = jnp.arange(NHW, dtype=jnp.int32)
    p = lane % HW
    row = p // W
    col = p % W
    rows = []
    for kh in range(KH):
        for kw in range(KW):
            dy, dx = kh - 1, kw - 1
            valid = ((row + dy >= 0) & (row + dy < H) &
                     (col + dx >= 0) & (col + dx < W))
            rows.append(valid.astype(jnp.float32))
    return jnp.stack(rows, axis=0)


def double_conv(x, w1, w2, s1, b1, s2, b2):
    """x: (N, C_IN, H, W) f32. Returns (N, C_OUT, H, W) f32."""
    # Activations: (C_IN, N*HW) with batch folded into lanes, channels padded.
    x_flat = jnp.transpose(x, (1, 0, 2, 3)).reshape(C_IN, NHW)
    x_pad = jnp.pad(x_flat, ((0, C_PAD - C_IN), (0, 0)))

    # Weights: im2col-packed, BN scale folded, bf16 for the MXU.
    w1_packed = _pack_weights(w1, s1, C_IN, C_PAD)      # (C_OUT, 72) bf16
    w2_packed = _pack_weights(w2, s2, C_OUT, C_OUT)     # (C_OUT, 72) bf16
    b1c = b1.reshape(C_OUT, 1).astype(jnp.float32)
    b2c = b2.reshape(C_OUT, 1).astype(jnp.float32)
    masks = _make_masks()                               # (9, NHW) f32

    out_flat = pl.pallas_call(
        doubleconv_kernel,
        out_shape=jax.ShapeDtypeStruct((C_OUT, NHW), jnp.float32),
        in_specs=[
            pl.BlockSpec((C_PAD, NHW), lambda: (0, 0)),
            pl.BlockSpec((KH * KW, NHW), lambda: (0, 0)),
            pl.BlockSpec((C_OUT, K1), lambda: (0, 0)),
            pl.BlockSpec((C_OUT, K2), lambda: (0, 0)),
            pl.BlockSpec((C_OUT, 1), lambda: (0, 0)),
            pl.BlockSpec((C_OUT, 1), lambda: (0, 0)),
        ],
        out_specs=pl.BlockSpec((C_OUT, NHW), lambda: (0, 0)),
        scratch_shapes=[pltpu.VMEM((KH * KW * C_PAD, NHW), jnp.float32)],
    )(x_pad, masks, w1_packed, w2_packed, b1c, b2c)

    return jnp.transpose(out_flat.reshape(C_OUT, N, H, W), (1, 0, 2, 3))


def reference_forward(x, w1, w2, s1, b1, s2, b2):
    """Pure-JAX reference (lax conv, HIGHEST precision), same folded BN."""
    prec = lax.Precision.HIGHEST
    y = lax.conv_general_dilated(
        x, w1, window_strides=(1, 1), padding=((1, 1), (1, 1)),
        dimension_numbers=("NCHW", "OIHW", "NCHW"), precision=prec)
    y = jnp.maximum(y * s1[None, :, None, None] + b1[None, :, None, None], 0.0)
    z = lax.conv_general_dilated(
        y, w2, window_strides=(1, 1), padding=((1, 1), (1, 1)),
        dimension_numbers=("NCHW", "OIHW", "NCHW"), precision=prec)
    z = jnp.maximum(z * s2[None, :, None, None] + b2[None, :, None, None], 0.0)
    return z


if __name__ == "__main__":
    key = jax.random.PRNGKey(0)
    kx, kw1, kw2, kg1, kb1, kg2, kb2 = jax.random.split(key, 7)

    x = jax.random.normal(kx, (N, C_IN, H, W), dtype=jnp.float32)

    # Conv weights (PyTorch OIHW shapes, bias=False)
    w1 = jax.random.normal(kw1, (C_OUT, C_IN, KH, KW), dtype=jnp.float32) * 0.2
    w2 = jax.random.normal(kw2, (C_OUT, C_OUT, KH, KW), dtype=jnp.float32) * 0.2

    # BatchNorm params (inference mode: running_mean=0, running_var=1, eps=1e-5)
    eps = 1e-5
    gamma1 = jax.random.normal(kg1, (C_OUT,), dtype=jnp.float32) * 0.1 + 1.0
    beta1 = jax.random.normal(kb1, (C_OUT,), dtype=jnp.float32) * 0.1
    gamma2 = jax.random.normal(kg2, (C_OUT,), dtype=jnp.float32) * 0.1 + 1.0
    beta2 = jax.random.normal(kb2, (C_OUT,), dtype=jnp.float32) * 0.1
    mean1 = jnp.zeros((C_OUT,), jnp.float32)
    var1 = jnp.ones((C_OUT,), jnp.float32)
    mean2 = jnp.zeros((C_OUT,), jnp.float32)
    var2 = jnp.ones((C_OUT,), jnp.float32)

    s1 = gamma1 / jnp.sqrt(var1 + eps)
    b1 = beta1 - mean1 * s1
    s2 = gamma2 / jnp.sqrt(var2 + eps)
    b2 = beta2 - mean2 * s2

    out = double_conv(x, w1, w2, s1, b1, s2, b2)
    out = jax.block_until_ready(out)

    ref = reference_forward(x, w1, w2, s1, b1, s2, b2)
    assert out.shape == (N, C_OUT, H, W)
    # Tolerance budgets for bf16 MXU operands across two stacked convs (f32
    # reference at HIGHEST precision). Structural bugs (shift/mask/weight
    # packing) produce O(1) errors and still fail.
    err = jnp.max(jnp.abs(out - ref))
    assert jnp.allclose(out, ref, atol=5e-2, rtol=5e-2), (
        f"mismatch vs reference, max abs err = {err}")

    print("KERNEL_OK")
</pallas_src>

<mosaic_0001>
module attributes {stable_mosaic.version = 11 : i64} {
  func.func @doubleconv_kernel(%arg0: memref<8x512xf32, #tpu.memory_space<vmem>>, %arg1: memref<9x512xf32, #tpu.memory_space<vmem>>, %arg2: memref<8x72xbf16, #tpu.memory_space<vmem>>, %arg3: memref<8x72xbf16, #tpu.memory_space<vmem>>, %arg4: memref<8x1xf32, #tpu.memory_space<vmem>>, %arg5: memref<8x1xf32, #tpu.memory_space<vmem>>, %arg6: memref<8x512xf32, #tpu.memory_space<vmem>>, %arg7: memref<72x512xf32, #tpu.memory_space<vmem>>) attributes {dimension_semantics = [], scalar_prefetch = 0 : i64, scratch_operands = 1 : i64, tpu.core_type = #tpu.core_type<tc>} {
    %c0 = arith.constant 0 : index
    %c0_0 = arith.constant 0 : index
    %0 = vector.load %arg0[%c0, %c0_0] : memref<8x512xf32, #tpu.memory_space<vmem>>, vector<8x512xf32>
    %c0_1 = arith.constant 0 : index
    %c0_2 = arith.constant 0 : index
    %1 = vector.load %arg2[%c0_1, %c0_2] : memref<8x72xbf16, #tpu.memory_space<vmem>>, vector<8x72xbf16>
    %c17_i32 = arith.constant 17 : i32
    %2 = tpu.dynamic_rotate %0 by %c17_i32 dim 1 : vector<8x512xf32>, i32 -> vector<8x512xf32>
    %c0_3 = arith.constant 0 : index
    %c0_4 = arith.constant 0 : index
    %3 = vector.load %arg1[%c0_3, %c0_4] : memref<9x512xf32, #tpu.memory_space<vmem>>, vector<1x512xf32>
    %4 = vector.broadcast %3 : vector<1x512xf32> to vector<8x512xf32>
    %5 = arith.mulf %2, %4 : vector<8x512xf32>
    %c0_5 = arith.constant 0 : index
    %c0_6 = arith.constant 0 : index
    %6 = vector.load %arg7[%c0_5, %c0_6] : memref<72x512xf32, #tpu.memory_space<vmem>>, vector<8x512xf32>
    tpu.vector_store %arg7[%c0_5, %c0_6], %5 {strides = array<i32>} : memref<72x512xf32, #tpu.memory_space<vmem>>, vector<8x512xf32>,
    %c16_i32 = arith.constant 16 : i32
    %7 = tpu.dynamic_rotate %0 by %c16_i32 dim 1 : vector<8x512xf32>, i32 -> vector<8x512xf32>
    %c1 = arith.constant 1 : index
    %c0_7 = arith.constant 0 : index
    %8 = vector.load %arg1[%c1, %c0_7] : memref<9x512xf32, #tpu.memory_space<vmem>>, vector<1x512xf32>
    %9 = vector.broadcast %8 : vector<1x512xf32> to vector<8x512xf32>
    %10 = arith.mulf %7, %9 : vector<8x512xf32>
    %c8 = arith.constant 8 : index
    %c0_8 = arith.constant 0 : index
    %11 = vector.load %arg7[%c8, %c0_8] : memref<72x512xf32, #tpu.memory_space<vmem>>, vector<8x512xf32>
    tpu.vector_store %arg7[%c8, %c0_8], %10 {strides = array<i32>} : memref<72x512xf32, #tpu.memory_space<vmem>>, vector<8x512xf32>,
    %c15_i32 = arith.constant 15 : i32
    %12 = tpu.dynamic_rotate %0 by %c15_i32 dim 1 : vector<8x512xf32>, i32 -> vector<8x512xf32>
    %c2 = arith.constant 2 : index
    %c0_9 = arith.constant 0 : index
    %13 = vector.load %arg1[%c2, %c0_9] : memref<9x512xf32, #tpu.memory_space<vmem>>, vector<1x512xf32>
    %14 = vector.broadcast %13 : vector<1x512xf32> to vector<8x512xf32>
    %15 = arith.mulf %12, %14 : vector<8x512xf32>
    %c16 = arith.constant 16 : index
    %c0_10 = arith.constant 0 : index
    %16 = vector.load %arg7[%c16, %c0_10] : memref<72x512xf32, #tpu.memory_space<vmem>>, vector<8x512xf32>
    tpu.vector_store %arg7[%c16, %c0_10], %15 {strides = array<i32>} : memref<72x512xf32, #tpu.memory_space<vmem>>, vector<8x512xf32>,
    %c1_i32 = arith.constant 1 : i32
    %17 = tpu.dynamic_rotate %0 by %c1_i32 dim 1 : vector<8x512xf32>, i32 -> vector<8x512xf32>
    %c3 = arith.constant 3 : index
    %c0_11 = arith.constant 0 : index
    %18 = vector.load %arg1[%c3, %c0_11] : memref<9x512xf32, #tpu.memory_space<vmem>>, vector<1x512xf32>
    %19 = vector.broadcast %18 : vector<1x512xf32> to vector<8x512xf32>
    %20 = arith.mulf %17, %19 : vector<8x512xf32>
    %c24 = arith.constant 24 : index
    %c0_12 = arith.constant 0 : index
    %21 = vector.load %arg7[%c24, %c0_12] : memref<72x512xf32, #tpu.memory_space<vmem>>, vector<8x512xf32>
    tpu.vector_store %arg7[%c24, %c0_12], %20 {strides = array<i32>} : memref<72x512xf32, #tpu.memory_space<vmem>>, vector<8x512xf32>,
    %c32 = arith.constant 32 : index
    %c0_13 = arith.constant 0 : index
    %22 = vector.load %arg7[%c32, %c0_13] : memref<72x512xf32, #tpu.memory_space<vmem>>, vector<8x512xf32>
    tpu.vector_store %arg7[%c32, %c0_13], %0 {strides = array<i32>} : memref<72x512xf32, #tpu.memory_space<vmem>>, vector<8x512xf32>,
    %c511_i32 = arith.constant 511 : i32
    %23 = tpu.dynamic_rotate %0 by %c511_i32 dim 1 : vector<8x512xf32>, i32 -> vector<8x512xf32>
    %c5 = arith.constant 5 : index
    %c0_14 = arith.constant 0 : index
    %24 = vector.load %arg1[%c5, %c0_14] : memref<9x512xf32, #tpu.memory_space<vmem>>, vector<1x512xf32>
    %25 = vector.broadcast %24 : vector<1x512xf32> to vector<8x512xf32>
    %26 = arith.mulf %23, %25 : vector<8x512xf32>
    %c40 = arith.constant 40 : index
    %c0_15 = arith.constant 0 : index
    %27 = vector.load %arg7[%c40, %c0_15] : memref<72x512xf32, #tpu.memory_space<vmem>>, vector<8x512xf32>
    tpu.vector_store %arg7[%c40, %c0_15], %26 {strides = array<i32>} : memref<72x512xf32, #tpu.memory_space<vmem>>, vector<8x512xf32>,
    %c497_i32 = arith.constant 497 : i32
    %28 = tpu.dynamic_rotate %0 by %c497_i32 dim 1 : vector<8x512xf32>, i32 -> vector<8x512xf32>
    %c6 = arith.constant 6 : index
    %c0_16 = arith.constant 0 : index
    %29 = vector.load %arg1[%c6, %c0_16] : memref<9x512xf32, #tpu.memory_space<vmem>>, vector<1x512xf32>
    %30 = vector.broadcast %29 : vector<1x512xf32> to vector<8x512xf32>
    %31 = arith.mulf %28, %30 : vector<8x512xf32>
    %c48 = arith.constant 48 : index
    %c0_17 = arith.constant 0 : index
    %32 = vector.load %arg7[%c48, %c0_17] : memref<72x512xf32, #tpu.memory_space<vmem>>, vector<8x512xf32>
    tpu.vector_store %arg7[%c48, %c0_17], %31 {strides = array<i32>} : memref<72x512xf32, #tpu.memory_space<vmem>>, vector<8x512xf32>,
    %c496_i32 = arith.constant 496 : i32
    %33 = tpu.dynamic_rotate %0 by %c496_i32 dim 1 : vector<8x512xf32>, i32 -> vector<8x512xf32>
    %c7 = arith.constant 7 : index
    %c0_18 = arith.constant 0 : index
    %34 = vector.load %arg1[%c7, %c0_18] : memref<9x512xf32, #tpu.memory_space<vmem>>, vector<1x512xf32>
    %35 = vector.broadcast %34 : vector<1x512xf32> to vector<8x512xf32>
    %36 = arith.mulf %33, %35 : vector<8x512xf32>
    %c56 = arith.constant 56 : index
    %c0_19 = arith.constant 0 : index
    %37 = vector.load %arg7[%c56, %c0_19] : memref<72x512xf32, #tpu.memory_space<vmem>>, vector<8x512xf32>
    tpu.vector_store %arg7[%c56, %c0_19], %36 {strides = array<i32>} : memref<72x512xf32, #tpu.memory_space<vmem>>, vector<8x512xf32>,
    %c495_i32 = arith.constant 495 : i32
    %38 = tpu.dynamic_rotate %0 by %c495_i32 dim 1 : vector<8x512xf32>, i32 -> vector<8x512xf32>
    %c8_20 = arith.constant 8 : index
    %c0_21 = arith.constant 0 : index
    %39 = vector.load %arg1[%c8_20, %c0_21] : memref<9x512xf32, #tpu.memory_space<vmem>>, vector<1x512xf32>
    %40 = vector.broadcast %39 : vector<1x512xf32> to vector<8x512xf32>
    %41 = arith.mulf %38, %40 : vector<8x512xf32>
    %c64 = arith.constant 64 : index
    %c0_22 = arith.constant 0 : index
    %42 = vector.load %arg7[%c64, %c0_22] : memref<72x512xf32, #tpu.memory_space<vmem>>, vector<8x512xf32>
    tpu.vector_store %arg7[%c64, %c0_22], %41 {strides = array<i32>} : memref<72x512xf32, #tpu.memory_space<vmem>>, vector<8x512xf32>,
    %c0_23 = arith.constant 0 : index
    %c0_24 = arith.constant 0 : index
    %43 = vector.load %arg7[%c0_23, %c0_24] : memref<72x512xf32, #tpu.memory_space<vmem>>, vector<72x512xf32>
    %44 = arith.truncf %43 : vector<72x512xf32> to vector<72x512xbf16>
    %cst = arith.constant dense<0.000000e+00> : vector<8x512xf32>
    %45 = tpu.matmul %1, %44, %cst {dimension_numbers = #tpu.dot_dimension_numbers<[1], [0], [0], [1], [0, 0, 1, 1], [], []>} : vector<8x72xbf16>, vector<72x512xbf16>, vector<8x512xf32> -> vector<8x512xf32>
    %c0_25 = arith.constant 0 : index
    %c0_26 = arith.constant 0 : index
    %46 = vector.load %arg4[%c0_25, %c0_26] : memref<8x1xf32, #tpu.memory_space<vmem>>, vector<8x1xf32>
    %47 = vector.broadcast %46 : vector<8x1xf32> to vector<8x512xf32>
    %48 = arith.addf %45, %47 : vector<8x512xf32>
    %cst_27 = arith.constant 0.000000e+00 : f32
    %49 = vector.broadcast %cst_27 : f32 to vector<8x512xf32>
    %50 = arith.maximumf %48, %49 : vector<8x512xf32>
    %c0_28 = arith.constant 0 : index
    %c0_29 = arith.constant 0 : index
    %51 = vector.load %arg3[%c0_28, %c0_29] : memref<8x72xbf16, #tpu.memory_space<vmem>>, vector<8x72xbf16>
    %c17_i32_30 = arith.constant 17 : i32
    %52 = tpu.dynamic_rotate %50 by %c17_i32_30 dim 1 : vector<8x512xf32>, i32 -> vector<8x512xf32>
    %c0_31 = arith.constant 0 : index
    %c0_32 = arith.constant 0 : index
    %53 = vector.load %arg1[%c0_31, %c0_32] : memref<9x512xf32, #tpu.memory_space<vmem>>, vector<1x512xf32>
    %54 = vector.broadcast %53 : vector<1x512xf32> to vector<8x512xf32>
    %55 = arith.mulf %52, %54 : vector<8x512xf32>
    %c0_33 = arith.constant 0 : index
    %c0_34 = arith.constant 0 : index
    %56 = vector.load %arg7[%c0_33, %c0_34] : memref<72x512xf32, #tpu.memory_space<vmem>>, vector<8x512xf32>
    tpu.vector_store %arg7[%c0_33, %c0_34], %55 {strides = array<i32>} : memref<72x512xf32, #tpu.memory_space<vmem>>, vector<8x512xf32>,
    %c16_i32_35 = arith.constant 16 : i32
    %57 = tpu.dynamic_rotate %50 by %c16_i32_35 dim 1 : vector<8x512xf32>, i32 -> vector<8x512xf32>
    %c1_36 = arith.constant 1 : index
    %c0_37 = arith.constant 0 : index
    %58 = vector.load %arg1[%c1_36, %c0_37] : memref<9x512xf32, #tpu.memory_space<vmem>>, vector<1x512xf32>
    %59 = vector.broadcast %58 : vector<1x512xf32> to vector<8x512xf32>
    %60 = arith.mulf %57, %59 : vector<8x512xf32>
    %c8_38 = arith.constant 8 : index
    %c0_39 = arith.constant 0 : index
    %61 = vector.load %arg7[%c8_38, %c0_39] : memref<72x512xf32, #tpu.memory_space<vmem>>, vector<8x512xf32>
    tpu.vector_store %arg7[%c8_38, %c0_39], %60 {strides = array<i32>} : memref<72x512xf32, #tpu.memory_space<vmem>>, vector<8x512xf32>,
    %c15_i32_40 = arith.constant 15 : i32
    %62 = tpu.dynamic_rotate %50 by %c15_i32_40 dim 1 : vector<8x512xf32>, i32 -> vector<8x512xf32>
    %c2_41 = arith.constant 2 : index
    %c0_42 = arith.constant 0 : index
    %63 = vector.load %arg1[%c2_41, %c0_42] : memref<9x512xf32, #tpu.memory_space<vmem>>, vector<1x512xf32>
    %64 = vector.broadcast %63 : vector<1x512xf32> to vector<8x512xf32>
    %65 = arith.mulf %62, %64 : vector<8x512xf32>
    %c16_43 = arith.constant 16 : index
    %c0_44 = arith.constant 0 : index
    %66 = vector.load %arg7[%c16_43, %c0_44] : memref<72x512xf32, #tpu.memory_space<vmem>>, vector<8x512xf32>
    tpu.vector_store %arg7[%c16_43, %c0_44], %65 {strides = array<i32>} : memref<72x512xf32, #tpu.memory_space<vmem>>, vector<8x512xf32>,
    %c1_i32_45 = arith.constant 1 : i32
    %67 = tpu.dynamic_rotate %50 by %c1_i32_45 dim 1 : vector<8x512xf32>, i32 -> vector<8x512xf32>
    %c3_46 = arith.constant 3 : index
    %c0_47 = arith.constant 0 : index
    %68 = vector.load %arg1[%c3_46, %c0_47] : memref<9x512xf32, #tpu.memory_space<vmem>>, vector<1x512xf32>
    %69 = vector.broadcast %68 : vector<1x512xf32> to vector<8x512xf32>
    %70 = arith.mulf %67, %69 : vector<8x512xf32>
    %c24_48 = arith.constant 24 : index
    %c0_49 = arith.constant 0 : index
    %71 = vector.load %arg7[%c24_48, %c0_49] : memref<72x512xf32, #tpu.memory_space<vmem>>, vector<8x512xf32>
    tpu.vector_store %arg7[%c24_48, %c0_49], %70 {strides = array<i32>} : memref<72x512xf32, #tpu.memory_space<vmem>>, vector<8x512xf32>,
    %c32_50 = arith.constant 32 : index
    %c0_51 = arith.constant 0 : index
    %72 = vector.load %arg7[%c32_50, %c0_51] : memref<72x512xf32, #tpu.memory_space<vmem>>, vector<8x512xf32>
    tpu.vector_store %arg7[%c32_50, %c0_51], %50 {strides = array<i32>} : memref<72x512xf32, #tpu.memory_space<vmem>>, vector<8x512xf32>,
    %c511_i32_52 = arith.constant 511 : i32
    %73 = tpu.dynamic_rotate %50 by %c511_i32_52 dim 1 : vector<8x512xf32>, i32 -> vector<8x512xf32>
    %c5_53 = arith.constant 5 : index
    %c0_54 = arith.constant 0 : index
    %74 = vector.load %arg1[%c5_53, %c0_54] : memref<9x512xf32, #tpu.memory_space<vmem>>, vector<1x512xf32>
    %75 = vector.broadcast %74 : vector<1x512xf32> to vector<8x512xf32>
    %76 = arith.mulf %73, %75 : vector<8x512xf32>
    %c40_55 = arith.constant 40 : index
    %c0_56 = arith.constant 0 : index
    %77 = vector.load %arg7[%c40_55, %c0_56] : memref<72x512xf32, #tpu.memory_space<vmem>>, vector<8x512xf32>
    tpu.vector_store %arg7[%c40_55, %c0_56], %76 {strides = array<i32>} : memref<72x512xf32, #tpu.memory_space<vmem>>, vector<8x512xf32>,
    %c497_i32_57 = arith.constant 497 : i32
    %78 = tpu.dynamic_rotate %50 by %c497_i32_57 dim 1 : vector<8x512xf32>, i32 -> vector<8x512xf32>
    %c6_58 = arith.constant 6 : index
    %c0_59 = arith.constant 0 : index
    %79 = vector.load %arg1[%c6_58, %c0_59] : memref<9x512xf32, #tpu.memory_space<vmem>>, vector<1x512xf32>
    %80 = vector.broadcast %79 : vector<1x512xf32> to vector<8x512xf32>
    %81 = arith.mulf %78, %80 : vector<8x512xf32>
    %c48_60 = arith.constant 48 : index
    %c0_61 = arith.constant 0 : index
    %82 = vector.load %arg7[%c48_60, %c0_61] : memref<72x512xf32, #tpu.memory_space<vmem>>, vector<8x512xf32>
    tpu.vector_store %arg7[%c48_60, %c0_61], %81 {strides = array<i32>} : memref<72x512xf32, #tpu.memory_space<vmem>>, vector<8x512xf32>,
    %c496_i32_62 = arith.constant 496 : i32
    %83 = tpu.dynamic_rotate %50 by %c496_i32_62 dim 1 : vector<8x512xf32>, i32 -> vector<8x512xf32>
    %c7_63 = arith.constant 7 : index
    %c0_64 = arith.constant 0 : index
    %84 = vector.load %arg1[%c7_63, %c0_64] : memref<9x512xf32, #tpu.memory_space<vmem>>, vector<1x512xf32>
    %85 = vector.broadcast %84 : vector<1x512xf32> to vector<8x512xf32>
    %86 = arith.mulf %83, %85 : vector<8x512xf32>
    %c56_65 = arith.constant 56 : index
    %c0_66 = arith.constant 0 : index
    %87 = vector.load %arg7[%c56_65, %c0_66] : memref<72x512xf32, #tpu.memory_space<vmem>>, vector<8x512xf32>
    tpu.vector_store %arg7[%c56_65, %c0_66], %86 {strides = array<i32>} : memref<72x512xf32, #tpu.memory_space<vmem>>, vector<8x512xf32>,
    %c495_i32_67 = arith.constant 495 : i32
    %88 = tpu.dynamic_rotate %50 by %c495_i32_67 dim 1 : vector<8x512xf32>, i32 -> vector<8x512xf32>
    %c8_68 = arith.constant 8 : index
    %c0_69 = arith.constant 0 : index
    %89 = vector.load %arg1[%c8_68, %c0_69] : memref<9x512xf32, #tpu.memory_space<vmem>>, vector<1x512xf32>
    %90 = vector.broadcast %89 : vector<1x512xf32> to vector<8x512xf32>
    %91 = arith.mulf %88, %90 : vector<8x512xf32>
    %c64_70 = arith.constant 64 : index
    %c0_71 = arith.constant 0 : index
    %92 = vector.load %arg7[%c64_70, %c0_71] : memref<72x512xf32, #tpu.memory_space<vmem>>, vector<8x512xf32>
    tpu.vector_store %arg7[%c64_70, %c0_71], %91 {strides = array<i32>} : memref<72x512xf32, #tpu.memory_space<vmem>>, vector<8x512xf32>,
    %c0_72 = arith.constant 0 : index
    %c0_73 = arith.constant 0 : index
    %93 = vector.load %arg7[%c0_72, %c0_73] : memref<72x512xf32, #tpu.memory_space<vmem>>, vector<72x512xf32>
    %94 = arith.truncf %93 : vector<72x512xf32> to vector<72x512xbf16>
    %cst_74 = arith.constant dense<0.000000e+00> : vector<8x512xf32>
    %95 = tpu.matmul %51, %94, %cst_74 {dimension_numbers = #tpu.dot_dimension_numbers<[1], [0], [0], [1], [0, 0, 1, 1], [], []>} : vector<8x72xbf16>, vector<72x512xbf16>, vector<8x512xf32> -> vector<8x512xf32>
    %c0_75 = arith.constant 0 : index
    %c0_76 = arith.constant 0 : index
    %96 = vector.load %arg5[%c0_75, %c0_76] : memref<8x1xf32, #tpu.memory_space<vmem>>, vector<8x1xf32>
    %97 = vector.broadcast %96 : vector<8x1xf32> to vector<8x512xf32>
    %98 = arith.addf %95, %97 : vector<8x512xf32>
    %cst_77 = arith.constant 0.000000e+00 : f32
    %99 = vector.broadcast %cst_77 : f32 to vector<8x512xf32>
    %100 = arith.maximumf %98, %99 : vector<8x512xf32>
    %c0_78 = arith.constant 0 : index
    %c0_79 = arith.constant 0 : index
    %101 = vector.load %arg6[%c0_78, %c0_79] : memref<8x512xf32, #tpu.memory_space<vmem>>, vector<8x512xf32>
    tpu.vector_store %arg6[%c0_78, %c0_79], %100 {strides = array<i32>} : memref<8x512xf32, #tpu.memory_space<vmem>>, vector<8x512xf32>,
    return
  }
}

</mosaic_0001>

<bundles_post_ra>
// kernel: tpu_custom_call.1
= control target key start
LH: loop header
LB: loop body
LE: loop exit
PB: predicated region body
PF: predicated region fallthrough
CT: control target
= control target key end

     0   :  { %11 = vsyncpa [#allocation4], 0  ;;  %s1680_s0 = inlined_call_operand.hbm [shape: f32[8,512], index: 0, kind: input, shape index: {}]   ;;  %s1681_s1 = inlined_call_operand.hbm [shape: f32[9,512], index: 1, kind: input, shape index: {}]   ;;  %s1682_s2 = inlined_call_operand.vmem [shape: bf16[8,72], index: 2, kind: input, shape index: {}]   ;;  %s1683_s3 = inlined_call_operand.vmem [shape: bf16[8,72], index: 3, kind: input, shape index: {}]   ;;  %s1684_s4 = inlined_call_operand.vmem [shape: f32[8,1], index: 4, kind: input, shape index: {}]   ;;  %s1685_s5 = inlined_call_operand.vmem [shape: f32[8,1], index: 5, kind: input, shape index: {}]   ;;  %s1686_s6 = inlined_call_operand.hbm [shape: f32[8,512], index: 6, kind: output, shape index: {}]  }
   0x1   :  { %12 = vsyncpa [#allocation7], 0 }
   0x2   :  { %13 = vsyncpa [#allocation5], 0  ;;  %s1197_s21 = smov [#allocation3]   ;;  %s1198_s23 = smov [#allocation6]  }
   0x3   :  { %s20_s22 = sshll.u32 %s1197_s21, 4  ;;  %s29_s24 = sshll.u32 %s1198_s23, 4  ;;  %s21_s22 = int_to_ptr.vmem [resolvable:$true] %s20_s22  ;;  %s1246_s24 = int_to_ptr.vmem [resolvable:$true] %s29_s24 }
   0x4   :  { %s1125_s27 = scalar_lea.hbm %s1680_s0, 512 }
   0x5   :  { %p1126_p0 = scmp.ne.s32.totalorder %s1680_s0, %s1125_s27  ;;  %p1129_p1 = scmp.lt.u32.totalorder %s1125_s27, %s1680_s0 }
   0x7   :  { %p1131_p2 = pnand %p1129_p1, %p1126_p0 }
   0x9   :  { %1134 = shalt.err (!%p1131_p2)
}
   0xa   :  { %s1135_s8 = scalar_lea.vmem %s21_s22, 512  ;;  %p1140_p4 = scmp.lt.s32.totalorder %s21_s22, %s21_s22 }
   0xb   :  { %p1136_p3 = scmp.ne.s32.totalorder %s21_s22, %s1135_s8  ;;  %p1141_p5 = scmp.lt.s32.totalorder %s1135_s8, %s1135_s8 }
   0xd   :  { %p1142_p6 = por %p1141_p5, %p1140_p4 }
   0xf   :  { %p1143_p7 = pnand %p1142_p6, %p1136_p3 }
  0x11   :  { %1146 = shalt.err (!%p1143_p7)
}
  0x12   :  { %23 = dma.hbm_to_vmem [thread:$0]  %s1680_s0, 512, %s21_s22, [#allocation4]  }
  0x13   :  { %s1147_s13 = scalar_lea.hbm %s1681_s1, 1024 }
  0x14   :  { %p1148_p8 = scmp.ne.s32.totalorder %s1681_s1, %s1147_s13  ;;  %p1151_p9 = scmp.lt.u32.totalorder %s1147_s13, %s1681_s1 }
  0x16   :  { %p1153_p10 = pnand %p1151_p9, %p1148_p8 }
  0x18   :  { %1156 = shalt.err (!%p1153_p10)
}
  0x19   :  { %s1157_s18 = scalar_lea.vmem %s1246_s24, 1024  ;;  %p1162_p12 = scmp.lt.s32.totalorder %s1246_s24, %s1246_s24 }
  0x1a   :  { %p1158_p11 = scmp.ne.s32.totalorder %s1246_s24, %s1157_s18  ;;  %p1163_p13 = scmp.lt.s32.totalorder %s1157_s18, %s1157_s18 }
  0x1c   :  { %p1164_p0 = por %p1163_p13, %p1162_p12 }
  0x1e   :  { %p1165_p1 = pnand %p1164_p0, %p1158_p11 }
  0x20   :  { %1168 = shalt.err (!%p1165_p1)
}
  0x21   :  { %s1199_s0 = smov 512   ;;  %s1200_s19 = smov 32  }
  0x22   :  { %35 = dma.hbm_to_vmem [thread:$0]  %s1681_s1, 1024, %s1246_s24, [#allocation7], %s1199_s0, %s1199_s0, %s1200_s19  }
  0x23   :  { %1191 = dma.done.wait [#allocation4], 512  }
  0x24   :  { %1192 = vsyncadd [#allocation4], 4294966784 }
  0x25   :  { %1193 = dma.done.wait [#allocation7], 1024  }
  0x26   :  { %1194 = vsyncadd [#allocation7], 4294966272  ;;  %v1277_v0 = vld [vmem:[#allocation3 + $0x10] sm:$0xff]  ;;  %v1279_v1 = vld [vmem:[#allocation3] sm:$0xff]  ;;  %s1201_s22 = smov 17   ;;  %s1202_s1 = smov 16   ;;  %v64_v6 = vlaneseq }
  0x27   :  { %60 = vrot.lane.b32.xlu1 %v1277_v0, %s1201_s22  ;;  %56 = vrot.lane.b32.xlu0 %v1279_v1, %s1201_s22  ;;  %v1285_v2 = vld [vmem:[#allocation3 + $0x18] sm:$0xff]  ;;  %v1287_v3 = vld [vmem:[#allocation3 + $0x8] sm:$0xff]  ;;  %s1203_s23 = smov 15   ;;  %s1204_s24 = smov 1   ;;  %v1208_v4 = vmov 0   ;;  %v469_v5 = vld [vmem:[%s1684_s4] sm:$0xff] }
  0x28   :  { %s1205_s25 = smov 127   ;;  %s1206_s26 = smov 113   ;;  %524 = vmatprep.mubr.bf16.mxu0 %v1208_v4  ;;  %565 = vmatprep.mubr.bf16.mxu1 %v1208_v4  ;;  %v74_v7 = vshrl.u32 %v64_v6, 7  ;;  %v1355_v10 = vand.u32 127, %v64_v6  ;;  %vm479_vm8 = vcmask 1043456   ;;  %vm475_vm9 = vcmask 588800  }
  0x29   :  { %s1207_s27 = smov 112   ;;  %1124 = vset.pattern.permute.xlu0 %v1208_v4  ;;  %s1209_s28 = smov 111   ;;  %v71_v12 = vld [vmem:[#allocation6] ss:$8 sm:$0xf] }
  0x2a   :  { %v1357_v11 = vsub.s32 1, %v74_v7  ;;  %v115_v13 = vld [vmem:[#allocation6 + $0x1] ss:$8 sm:$0xf]  ;;  %vm66_vm0 = vcmp.lt.s32.totalorder %v1355_v10, 17  ;;  %v1360_v14 = vsub.s32 0, %v74_v7 }
  0x2b   :  { %62 = vrot.lane.b32.xlu1 %v1285_v2, %s1201_s22  ;;  %58 = vrot.lane.b32.xlu0 %v1287_v3, %s1201_s22  ;;  %v1362_v15 = vsub.s32 2, %v74_v7  ;;  %v1364_v16 = vsub.s32 3, %v74_v7  ;;  %vm109_vm1 = vcmp.lt.s32.totalorder %v1355_v10, 16  ;;  %v159_v53 = vld [vmem:[#allocation6 + $0x2] ss:$8 sm:$0xf] }
  0x2c   :  { %v80_v19 = vrot.slane %v71_v12, %v1357_v11  ;;  %v124_v20 = vrot.slane %v115_v13, %v1357_v11  ;;  %v76_v22 = vrot.slane %v71_v12, %v1360_v14  ;;  %v120_v29 = vrot.slane %v115_v13, %v1360_v14  ;;  %v203_v54 = vld [vmem:[#allocation6 + $0x3] ss:$8 sm:$0xf] }
  0x2d   :  { %v84_v23 = vrot.slane %v71_v12, %v1362_v15  ;;  %v88_v26 = vrot.slane %v71_v12, %v1364_v16  ;;  %v128_v30 = vrot.slane %v115_v13, %v1362_v15  ;;  %v132_v34 = vrot.slane %v115_v13, %v1364_v16 }
  0x2e   :  { %vm153_vm2 = vcmp.lt.s32.totalorder %v1355_v10, 15  ;;  %v168_v57 = vrot.slane %v159_v53, %v1357_v11  ;;  %vm197_vm3 = vcmp.lt.s32.totalorder %v1355_v10, 1  ;;  %v212_v58 = vrot.slane %v203_v54, %v1357_v11 }
  0x2f   :  { %103 = vrot.lane.b32.xlu1 %v1287_v3, %s1202_s1  ;;  %101 = vrot.lane.b32.xlu0 %v1279_v1, %s1202_s1  ;;  %v164_v60 = vrot.slane %v159_v53, %v1360_v14  ;;  %v172_v61 = vrot.slane %v159_v53, %v1362_v15  ;;  %v176_v62 = vrot.slane %v159_v53, %v1364_v16  ;;  %vm245_vm4 = vcmp.lt.s32.totalorder %v1355_v10, 127 }
  0x30   :  { %vm333_vm5 = vcmp.lt.s32.totalorder %v1355_v10, 112  ;;  %vm289_vm6 = vcmp.lt.s32.totalorder %v1355_v10, 113  ;;  %vm377_vm7 = vcmp.lt.s32.totalorder %v1355_v10, 111 }
  0x33   :  { %107 = vrot.lane.b32.xlu1 %v1285_v2, %s1202_s1  ;;  %105 = vrot.lane.b32.xlu0 %v1277_v0, %s1202_s1 }
  0x37   :  { %147 = vrot.lane.b32.xlu1 %v1287_v3, %s1203_s23  ;;  %145 = vrot.lane.b32.xlu0 %v1279_v1, %s1203_s23 }
  0x3b   :  { %151 = vrot.lane.b32.xlu1 %v1285_v2, %s1203_s23  ;;  %149 = vrot.lane.b32.xlu0 %v1277_v0, %s1203_s23 }
  0x3f   :  { %191 = vrot.lane.b32.xlu1 %v1287_v3, %s1204_s24  ;;  %189 = vrot.lane.b32.xlu0 %v1279_v1, %s1204_s24 }
  0x43   :  { %195 = vrot.lane.b32.xlu1 %v1285_v2, %s1204_s24  ;;  %193 = vrot.lane.b32.xlu0 %v1277_v0, %s1204_s24 }
  0x47   :  { %239 = vrot.lane.b32.xlu1 %v1287_v3, %s1205_s25  ;;  %237 = vrot.lane.b32.xlu0 %v1279_v1, %s1205_s25 }
  0x4b   :  { %243 = vrot.lane.b32.xlu1 %v1285_v2, %s1205_s25  ;;  %241 = vrot.lane.b32.xlu0 %v1277_v0, %s1205_s25 }
  0x4f   :  { %283 = vrot.lane.b32.xlu1 %v1287_v3, %s1206_s26  ;;  %281 = vrot.lane.b32.xlu0 %v1279_v1, %s1206_s26 }
  0x53   :  { %287 = vrot.lane.b32.xlu1 %v1285_v2, %s1206_s26  ;;  %285 = vrot.lane.b32.xlu0 %v1277_v0, %s1206_s26 }
  0x57   :  { %327 = vrot.lane.b32.xlu1 %v1287_v3, %s1207_s27  ;;  %325 = vrot.lane.b32.xlu0 %v1279_v1, %s1207_s27 }
  0x5b   :  { %331 = vrot.lane.b32.xlu1 %v1285_v2, %s1207_s27  ;;  %329 = vrot.lane.b32.xlu0 %v1277_v0, %s1207_s27 }
  0x5f   :  { %371 = vrot.lane.b32.xlu1 %v1287_v3, %s1209_s28  ;;  %369 = vrot.lane.b32.xlu0 %v1279_v1, %s1209_s28 }
  0x63   :  { %375 = vrot.lane.b32.xlu1 %v1285_v2, %s1209_s28  ;;  %373 = vrot.lane.b32.xlu0 %v1277_v0, %s1209_s28 }
  0x67   :  { %472 = vperm.xlu0 %1124, %v469_v5  }
  0x99   :  { %v61_v8 = vpop.permute.xlu1 %60  ;;  %v57_v9 = vpop.permute.xlu0 %56 }
  0x9d   :  { %v63_v17 = vpop.permute.xlu1 %62  ;;  %v59_v18 = vpop.permute.xlu0 %58 }
  0x9e   :  { %v69_v21 = vsel %vm66_vm0, %v57_v9, %v59_v18  ;;  %v70_v27 = vsel %vm66_vm0, %v63_v17, %v57_v9  ;;  %v68_v31 = vsel %vm66_vm0, %v59_v18, %v61_v8  ;;  %v67_v35 = vsel %vm66_vm0, %v61_v8, %v63_v17 }
  0x9f   :  { %v94_v32 = vmul.f32 %v80_v19, %v69_v21  ;;  %v93_v36 = vmul.f32 %v76_v22, %v70_v27  ;;  %v95_v40 = vmul.f32 %v84_v23, %v68_v31  ;;  %v96_v46 = vmul.f32 %v88_v26, %v67_v35 }
  0xa0   :  { %v208_v8 = vrot.slane %v203_v54, %v1360_v14  ;;  %v216_v9 = vrot.slane %v203_v54, %v1362_v15  ;;  %v220_v18 = vrot.slane %v203_v54, %v1364_v16 }
  0xa1   :  { %v104_v24 = vpop.permute.xlu1 %103  ;;  %v102_v25 = vpop.permute.xlu0 %101 }
  0xa2   :  { %v112_v28 = vsel %vm109_vm1, %v102_v25, %v104_v24 }
  0xa3   :  { %v138_v33 = vmul.f32 %v124_v20, %v112_v28 }
  0xa5   :  { %v108_v37 = vpop.permute.xlu1 %107  ;;  %v106_v38 = vpop.permute.xlu0 %105  ;;  %v450_v39 = vpack.c.bf16 %v138_v33, %v94_v32  ;;  %v251_v32 = vld [vmem:[#allocation6 + $0x5] ss:$8 sm:$0xf] }
  0xa6   :  { %v113_v41 = vsel %vm109_vm1, %v108_v37, %v102_v25  ;;  %v110_v42 = vsel %vm109_vm1, %v106_v38, %v108_v37  ;;  %v111_v43 = vsel %vm109_vm1, %v104_v24, %v106_v38  ;;  %v256_v38 = vrot.slane %v251_v32, %v1360_v14 }
  0xa7   :  { %v137_v44 = vmul.f32 %v120_v29, %v113_v41  ;;  %v139_v45 = vmul.f32 %v128_v30, %v111_v43  ;;  %492 = vmatprep.subr.bf16.mxu0 %v450_v39  ;;  %v140_v47 = vmul.f32 %v132_v34, %v110_v42  ;;  %v268_v39 = vrot.slane %v251_v32, %v1364_v16 }
  0xa8   :  { %v260_v41 = vrot.slane %v251_v32, %v1357_v11  ;;  %v264_v42 = vrot.slane %v251_v32, %v1362_v15 }
  0xa9   :  { %v148_v48 = vpop.permute.xlu1 %147  ;;  %v146_v49 = vpop.permute.xlu0 %145  ;;  %v449_v50 = vpack.c.bf16 %v137_v44, %v93_v36  ;;  %v452_v51 = vpack.c.bf16 %v140_v47, %v96_v46  ;;  %v451_v52 = vpack.c.bf16 %v139_v45, %v95_v40 }
  0xaa   :  { %v156_v59 = vsel %vm153_vm2, %v146_v49, %v148_v48 }
  0xab   :  { %493 = vmatpush1.bf16.msra.mxu0 %v449_v50  ;;  %533 = vmatprep.subr.bf16.mxu1 %v452_v51  ;;  %v182_v12 = vmul.f32 %v168_v57, %v156_v59 }
  0xac   :  { %534 = vmatpush1.bf16.msra.mxu1 %v451_v52 }
  0xad   :  { %v152_v55 = vpop.permute.xlu1 %151  ;;  %v150_v56 = vpop.permute.xlu0 %149 }
  0xae   :  { %v157_v6 = vsel %vm153_vm2, %v152_v55, %v146_v49  ;;  %v155_v13 = vsel %vm153_vm2, %v148_v48, %v150_v56  ;;  %v154_v19 = vsel %vm153_vm2, %v150_v56, %v152_v55 }
  0xaf   :  { %v181_v20 = vmul.f32 %v164_v60, %v157_v6  ;;  %v183_v24 = vmul.f32 %v172_v61, %v155_v13  ;;  %v184_v28 = vmul.f32 %v176_v62, %v154_v19  ;;  %v339_v60 = vld [vmem:[#allocation6 + $0x7] ss:$8 sm:$0xf]  ;;  %v295_v61 = vld [vmem:[#allocation6 + $0x6] ss:$8 sm:$0xf] }
  0xb0   :  { %v344_v6 = vrot.slane %v339_v60, %v1360_v14  ;;  %v352_v13 = vrot.slane %v339_v60, %v1362_v15 }
  0xb1   :  { %v192_v63 = vpop.permute.xlu1 %191  ;;  %v190_v5 = vpop.permute.xlu0 %189 }
  0xb2   :  { %v200_v7 = vsel %vm197_vm3, %v190_v5, %v192_v63 }
  0xb3   :  { %v226_v17 = vmul.f32 %v212_v58, %v200_v7  ;;  %v383_v7 = vld [vmem:[#allocation6 + $0x20] ss:$8 sm:$0xf] }
  0xb5   :  { %v196_v21 = vpop.permute.xlu1 %195  ;;  %v194_v22 = vpop.permute.xlu0 %193  ;;  %v454_v23 = vpack.c.bf16 %v226_v17, %v182_v12  ;;  %v348_v12 = vrot.slane %v339_v60, %v1357_v11  ;;  %v300_v17 = vrot.slane %v295_v61, %v1360_v14 }
  0xb6   :  { %v201_v25 = vsel %vm197_vm3, %v196_v21, %v190_v5  ;;  %v198_v26 = vsel %vm197_vm3, %v194_v22, %v196_v21  ;;  %v199_v27 = vsel %vm197_vm3, %v192_v63, %v194_v22  ;;  %v308_v63 = vrot.slane %v295_v61, %v1362_v15 }
  0xb7   :  { %v225_v29 = vmul.f32 %v208_v8, %v201_v25  ;;  %v227_v30 = vmul.f32 %v216_v9, %v199_v27  ;;  %v228_v31 = vmul.f32 %v220_v18, %v198_v26  ;;  %494 = vmatprep.subr.bf16.mxu0 %v454_v23  ;;  %v356_v9 = vrot.slane %v339_v60, %v1364_v16 }
  0xb9   :  { %v240_v33 = vpop.permute.xlu1 %239  ;;  %v238_v34 = vpop.permute.xlu0 %237  ;;  %v453_v35 = vpack.c.bf16 %v225_v29, %v181_v20  ;;  %v456_v36 = vpack.c.bf16 %v228_v31, %v184_v28  ;;  %v455_v37 = vpack.c.bf16 %v227_v30, %v183_v24  ;;  %v388_v24 = vrot.slane %v383_v7, %v1360_v14 }
  0xba   :  { %v248_v40 = vsel %vm245_vm4, %v238_v34, %v240_v33 }
  0xbb   :  { %495 = vmatpush1.bf16.msra.mxu0 %v453_v35  ;;  %535 = vmatprep.subr.bf16.mxu1 %v456_v36  ;;  %v273_v45 = vmul.f32 %v256_v38, %v248_v40 }
  0xbc   :  { %536 = vmatpush1.bf16.msra.mxu1 %v455_v37 }
  0xbd   :  { %v244_v43 = vpop.permute.xlu1 %243  ;;  %v242_v44 = vpop.permute.xlu0 %241  ;;  %v457_v57 = vpack.c.bf16 %v273_v45, %v1279_v1 }
  0xbe   :  { %v249_v46 = vsel %vm245_vm4, %v244_v43, %v238_v34  ;;  %v246_v47 = vsel %vm245_vm4, %v242_v44, %v244_v43  ;;  %v247_v48 = vsel %vm245_vm4, %v240_v33, %v242_v44  ;;  %v392_v43 = vrot.slane %v383_v7, %v1357_v11 }
  0xbf   :  { %v276_v49 = vmul.f32 %v268_v39, %v249_v46  ;;  %v274_v50 = vmul.f32 %v260_v41, %v247_v48  ;;  %v275_v51 = vmul.f32 %v264_v42, %v246_v47  ;;  %v400_v41 = vrot.slane %v383_v7, %v1364_v16 }
  0xc0   :  { %v396_v44 = vrot.slane %v383_v7, %v1362_v15 }
  0xc1   :  { %v284_v52 = vpop.permute.xlu1 %283  ;;  %v282_v53 = vpop.permute.xlu0 %281  ;;  %v458_v54 = vpack.c.bf16 %v274_v50, %v1287_v3  ;;  %v460_v55 = vpack.c.bf16 %v276_v49, %v1285_v2  ;;  %v459_v56 = vpack.c.bf16 %v275_v51, %v1277_v0  ;;  %v312_v3 = vrot.slane %v295_v61, %v1364_v16 }
  0xc2   :  { %v304_v2 = vrot.slane %v295_v61, %v1357_v11  ;;  %v292_v19 = vsel %vm289_vm6, %v282_v53, %v284_v52 }
  0xc3   :  { %496 = vmatprep.subr.bf16.mxu0 %v458_v54  ;;  %537 = vmatprep.subr.bf16.mxu1 %v460_v55  ;;  %v317_v33 = vmul.f32 %v300_v17, %v292_v19 }
  0xc4   :  { %497 = vmatpush1.bf16.msra.mxu0 %v457_v57  ;;  %538 = vmatpush1.bf16.msra.mxu1 %v459_v56 }
  0xc5   :  { %v288_v58 = vpop.permute.xlu1 %287  ;;  %v286_v59 = vpop.permute.xlu0 %285 }
  0xc6   :  { %v293_v1 = vsel %vm289_vm6, %v288_v58, %v282_v53  ;;  %v291_v5 = vsel %vm289_vm6, %v284_v52, %v286_v59  ;;  %v290_v18 = vsel %vm289_vm6, %v286_v59, %v288_v58  ;;  %v55_v59 = vld [vmem:[%s1682_s2] sm:$0xf] }
  0xc7   :  { %v320_v20 = vmul.f32 %v312_v3, %v293_v1  ;;  %v318_v21 = vmul.f32 %v304_v2, %v291_v5  ;;  %v319_v29 = vmul.f32 %v308_v63, %v290_v18  ;;  %v975_v18 = vld [vmem:[%s1685_s5] sm:$0xff] }
  0xc9   :  { %v328_v62 = vpop.permute.xlu1 %327  ;;  %v326_v0 = vpop.permute.xlu0 %325 }
  0xca   :  { %v336_v8 = vsel %vm333_vm5, %v326_v0, %v328_v62 }
  0xcb   :  { %v361_v25 = vmul.f32 %v344_v6, %v336_v8 }
  0xcd   :  { %v332_v22 = vpop.permute.xlu1 %331  ;;  %v330_v23 = vpop.permute.xlu0 %329  ;;  %v461_v40 = vpack.c.bf16 %v361_v25, %v317_v33 }
  0xce   :  { %v337_v26 = vsel %vm333_vm5, %v332_v22, %v326_v0  ;;  %v334_v27 = vsel %vm333_vm5, %v330_v23, %v332_v22  ;;  %v335_v28 = vsel %vm333_vm5, %v328_v62, %v330_v23  ;;  %v591_v23 = vld [vmem:[#allocation6] ss:$8 sm:$0xf] }
  0xcf   :  { %v364_v30 = vmul.f32 %v356_v9, %v337_v26  ;;  %v362_v31 = vmul.f32 %v348_v12, %v335_v28  ;;  %v363_v32 = vmul.f32 %v352_v13, %v334_v27  ;;  %v600_v27 = vrot.slane %v591_v23, %v1357_v11 }
  0xd0   :  { %v608_v33 = vrot.slane %v591_v23, %v1364_v16 }
  0xd1   :  { %v372_v34 = vpop.permute.xlu1 %371  ;;  %v370_v35 = vpop.permute.xlu0 %369  ;;  %v462_v36 = vpack.c.bf16 %v362_v31, %v318_v21  ;;  %v464_v37 = vpack.c.bf16 %v364_v30, %v320_v20  ;;  %v463_v38 = vpack.c.bf16 %v363_v32, %v319_v29  ;;  %v596_v30 = vrot.slane %v591_v23, %v1360_v14 }
  0xd2   :  { %v380_v39 = vsel %vm377_vm7, %v370_v35, %v372_v34 }
  0xd3   :  { %v405_v42 = vmul.f32 %v388_v24, %v380_v39  ;;  %498 = vmatprep.subr.bf16.mxu0 %v462_v36  ;;  %539 = vmatprep.subr.bf16.mxu1 %v464_v37  ;;  %v633_v24 = vld [vmem:[#allocation6 + $0x1] ss:$8 sm:$0xf] }
  0xd4   :  { %499 = vmatpush1.bf16.msra.mxu0 %v461_v40  ;;  %540 = vmatpush1.bf16.msra.mxu1 %v463_v38  ;;  %v642_v28 = vrot.slane %v633_v24, %v1357_v11  ;;  %v638_v36 = vrot.slane %v633_v24, %v1360_v14  ;;  %v650_v40 = vrot.slane %v633_v24, %v1364_v16 }
  0xd5   :  { %v376_v45 = vpop.permute.xlu1 %375  ;;  %v374_v46 = vpop.permute.xlu0 %373  ;;  %v465_v50 = vpack.c.bf16 %v405_v42, %v405_v42 }
  0xd6   :  { %v381_v47 = vsel %vm377_vm7, %v376_v45, %v370_v35  ;;  %v378_v48 = vsel %vm377_vm7, %v374_v46, %v376_v45  ;;  %v379_v49 = vsel %vm377_vm7, %v372_v34, %v374_v46  ;;  %v646_v34 = vrot.slane %v633_v24, %v1362_v15 }
  0xd7   :  { %v408_v51 = vmul.f32 %v400_v41, %v381_v47  ;;  %v406_v52 = vmul.f32 %v392_v43, %v379_v49  ;;  %v407_v53 = vmul.f32 %v396_v44, %v378_v48  ;;  %v481_v57 = vsel %vm479_vm8, %v465_v50, 0 }
  0xd8   :  { %v604_v41 = vrot.slane %v591_v23, %v1362_v15 }
  0xd9   :  { %v468_v54 = vpack.c.bf16 %v408_v51, %v408_v51  ;;  %v466_v55 = vpack.c.bf16 %v406_v52, %v406_v52  ;;  %v467_v56 = vpack.c.bf16 %v407_v53, %v407_v53 }
  0xdb   :  { %1102 = vmatprep.subr.msk.bf16.mxu0 %vm479_vm8, %v466_v55  ;;  %1104 = vmatprep.subr.msk.bf16.mxu1 %vm479_vm8, %v468_v54  ;;  %v487_v58 = vsel %vm479_vm8, %v467_v56, 0 }
  0xdc   :  { %501 = vmatpush1.bf16.msra.mxu0 %v481_v57  ;;  %542 = vmatpush1.bf16.msra.mxu1 %v487_v58 }
  0xdf   :  { %1103 = vmatmul.mubr.msk.bf16.vlgmr.msra.gmra.mrb[0].mxu0 %vm475_vm9, %v55_v59  ;;  %1105 = vmatmul.mubr.msk.bf16.vlgmr.msra.gmra.mrb[0].mxu1 %vm475_vm9, %v55_v59 }
  0xe0   :  { %1028 = vmatprep.mubr.bf16.mxu0 %v1208_v4  ;;  %1069 = vmatprep.mubr.bf16.mxu1 %v1208_v4 }
  0xe6   :  { %v473_v60 = vpop.permute.xlu0 %472 }
 0x1b2   :  { %v526_v61 = vpop.f32.mrb[0].mxu0  ;;  %v567_v3 = vpop.f32.mrb[0].mxu1 }
 0x1b3   :  { %v527_v2 = vadd.f32 %v526_v61, %v473_v60  ;;  %v568_v62 = vadd.f32 %v567_v3, %v473_v60  ;;  %v528_v0 = vpop.f32.mrb[1].mxu0  ;;  %v569_v1 = vpop.f32.mrb[1].mxu1  ;;  %v675_v61 = vld [vmem:[#allocation6 + $0x2] ss:$8 sm:$0xf] }
 0x1b4   :  { %v530_v63 = vpop.f32.mrb[2].mxu0  ;;  %v571_v5 = vpop.f32.mrb[2].mxu1  ;;  %v529_v8 = vadd.f32 %v528_v0, %v473_v60  ;;  %v570_v13 = vadd.f32 %v569_v1, %v473_v60  ;;  %v717_v3 = vld [vmem:[#allocation6 + $0x3] ss:$8 sm:$0xf]  ;;  %v684_v0 = vrot.slane %v675_v61, %v1357_v11 }
 0x1b5   :  { %v1484_v6 = vmax.f32 %v527_v2, 0.0  ;;  %v1486_v7 = vmax.f32 %v568_v62, 0.0  ;;  %v531_v9 = vpop.f32.mrb[3].mxu0  ;;  %v572_v12 = vpop.f32.mrb[3].mxu1  ;;  %v726_v1 = vrot.slane %v717_v3, %v1357_v11  ;;  %v680_v5 = vrot.slane %v675_v61, %v1360_v14 }
 0x1b6   :  { %v1492_v4 = vmax.f32 %v529_v8, 0.0  ;;  %v1498_v17 = vmax.f32 %v570_v13, 0.0  ;;  %v692_v12 = vrot.slane %v675_v61, %v1364_v16  ;;  %v730_v13 = vrot.slane %v717_v3, %v1362_v15 }
 0x1b7   :  { %583 = vrot.lane.b32.xlu0 %v1486_v7, %s1201_s22  ;;  %579 = vrot.lane.b32.xlu1 %v1484_v6, %s1201_s22  ;;  %v734_v24 = vrot.slane %v717_v3, %v1364_v16 }
 0x1bb   :  { %621 = vrot.lane.b32.xlu0 %v1484_v6, %s1202_s1  ;;  %581 = vrot.lane.b32.xlu1 %v1492_v4, %s1201_s22 }
 0x1bf   :  { %625 = vrot.lane.b32.xlu0 %v1486_v7, %s1202_s1  ;;  %585 = vrot.lane.b32.xlu1 %v1498_v17, %s1201_s22 }
 0x1c3   :  { %663 = vrot.lane.b32.xlu0 %v1484_v6, %s1203_s23  ;;  %623 = vrot.lane.b32.xlu1 %v1492_v4, %s1202_s1 }
 0x1c7   :  { %667 = vrot.lane.b32.xlu0 %v1486_v7, %s1203_s23  ;;  %627 = vrot.lane.b32.xlu1 %v1498_v17, %s1202_s1 }
 0x1cb   :  { %705 = vrot.lane.b32.xlu0 %v1484_v6, %s1204_s24  ;;  %665 = vrot.lane.b32.xlu1 %v1492_v4, %s1203_s23 }
 0x1cf   :  { %709 = vrot.lane.b32.xlu0 %v1486_v7, %s1204_s24  ;;  %669 = vrot.lane.b32.xlu1 %v1498_v17, %s1203_s23 }
 0x1d3   :  { %751 = vrot.lane.b32.xlu0 %v1484_v6, %s1205_s25  ;;  %707 = vrot.lane.b32.xlu1 %v1492_v4, %s1204_s24 }
 0x1d7   :  { %755 = vrot.lane.b32.xlu0 %v1486_v7, %s1205_s25  ;;  %711 = vrot.lane.b32.xlu1 %v1498_v17, %s1204_s24 }
 0x1db   :  { %793 = vrot.lane.b32.xlu0 %v1484_v6, %s1206_s26  ;;  %753 = vrot.lane.b32.xlu1 %v1492_v4, %s1205_s25 }
 0x1df   :  { %797 = vrot.lane.b32.xlu0 %v1486_v7, %s1206_s26  ;;  %757 = vrot.lane.b32.xlu1 %v1498_v17, %s1205_s25 }
 0x1e3   :  { %835 = vrot.lane.b32.xlu0 %v1484_v6, %s1207_s27  ;;  %795 = vrot.lane.b32.xlu1 %v1492_v4, %s1206_s26 }
 0x1e7   :  { %839 = vrot.lane.b32.xlu0 %v1486_v7, %s1207_s27  ;;  %799 = vrot.lane.b32.xlu1 %v1498_v17, %s1206_s26 }
 0x1eb   :  { %877 = vrot.lane.b32.xlu0 %v1484_v6, %s1209_s28  ;;  %837 = vrot.lane.b32.xlu1 %v1492_v4, %s1207_s27 }
 0x1ef   :  { %881 = vrot.lane.b32.xlu0 %v1486_v7, %s1209_s28  ;;  %841 = vrot.lane.b32.xlu1 %v1498_v17, %s1207_s27 }
 0x1f3   :  { %978 = vperm.xlu0 %1124, %v975_v18   ;;  %879 = vrot.lane.b32.xlu1 %v1492_v4, %s1209_s28 }
 0x1f7   :  { %883 = vrot.lane.b32.xlu1 %v1498_v17, %s1209_s28 }
 0x229   :  { %v584_v19 = vpop.permute.xlu0 %583  ;;  %v580_v20 = vpop.permute.xlu1 %579 }
 0x22d   :  { %v622_v21 = vpop.permute.xlu0 %621  ;;  %v582_v22 = vpop.permute.xlu1 %581 }
 0x22e   :  { %v589_v29 = vsel %vm66_vm0, %v580_v20, %v582_v22  ;;  %v588_v44 = vsel %vm66_vm0, %v582_v22, %v584_v19 }
 0x22f   :  { %v614_v37 = vmul.f32 %v600_v27, %v589_v29  ;;  %v615_v55 = vmul.f32 %v604_v41, %v588_v44 }
 0x231   :  { %v626_v25 = vpop.permute.xlu0 %625  ;;  %v586_v26 = vpop.permute.xlu1 %585 }
 0x232   :  { %v587_v42 = vsel %vm66_vm0, %v584_v19, %v586_v26  ;;  %v590_v43 = vsel %vm66_vm0, %v586_v26, %v580_v20  ;;  %v722_v19 = vrot.slane %v717_v3, %v1360_v14  ;;  %v763_v20 = vld [vmem:[#allocation6 + $0x5] ss:$8 sm:$0xf] }
 0x233   :  { %v613_v51 = vmul.f32 %v596_v30, %v590_v43  ;;  %v616_v52 = vmul.f32 %v608_v33, %v587_v42  ;;  %v768_v33 = vrot.slane %v763_v20, %v1360_v14 }
 0x235   :  { %v664_v31 = vpop.permute.xlu0 %663  ;;  %v624_v32 = vpop.permute.xlu1 %623 }
 0x236   :  { %v631_v35 = vsel %vm109_vm1, %v622_v21, %v624_v32  ;;  %v630_v38 = vsel %vm109_vm1, %v624_v32, %v626_v25 }
 0x237   :  { %v656_v39 = vmul.f32 %v642_v28, %v631_v35  ;;  %v657_v48 = vmul.f32 %v646_v34, %v630_v38 }
 0x239   :  { %v668_v45 = vpop.permute.xlu0 %667  ;;  %v628_v46 = vpop.permute.xlu1 %627  ;;  %v956_v47 = vpack.c.bf16 %v656_v39, %v614_v37  ;;  %v957_v60 = vpack.c.bf16 %v657_v48, %v615_v55  ;;  %v772_v37 = vrot.slane %v763_v20, %v1357_v11 }
 0x23a   :  { %v629_v49 = vsel %vm109_vm1, %v626_v25, %v628_v46  ;;  %v632_v50 = vsel %vm109_vm1, %v628_v46, %v622_v21  ;;  %v688_v25 = vrot.slane %v675_v61, %v1362_v15 }
 0x23b   :  { %v655_v53 = vmul.f32 %v638_v36, %v632_v50  ;;  %v658_v54 = vmul.f32 %v650_v40, %v629_v49  ;;  %996 = vmatprep.subr.bf16.mxu0 %v956_v47  ;;  %v776_v49 = vrot.slane %v763_v20, %v1362_v15 }
 0x23d   :  { %v955_v56 = vpack.c.bf16 %v655_v53, %v613_v51  ;;  %v706_v57 = vpop.permute.xlu0 %705  ;;  %v666_v58 = vpop.permute.xlu1 %665  ;;  %v958_v59 = vpack.c.bf16 %v658_v54, %v616_v52  ;;  %v780_v52 = vrot.slane %v763_v20, %v1364_v16 }
 0x23e   :  { %v673_v63 = vsel %vm153_vm2, %v664_v31, %v666_v58  ;;  %v672_v28 = vsel %vm153_vm2, %v666_v58, %v668_v45 }
 0x23f   :  { %997 = vmatpush1.bf16.msra.mxu0 %v955_v56  ;;  %1037 = vmatprep.subr.bf16.mxu1 %v958_v59  ;;  %v698_v21 = vmul.f32 %v684_v0, %v673_v63  ;;  %v699_v41 = vmul.f32 %v688_v25, %v672_v28  ;;  %v889_v28 = vld [vmem:[#allocation6 + $0x20] ss:$8 sm:$0xf] }
 0x240   :  { %1038 = vmatpush1.bf16.msra.mxu1 %v957_v60 }
 0x241   :  { %v710_v2 = vpop.permute.xlu0 %709  ;;  %v670_v62 = vpop.permute.xlu1 %669 }
 0x242   :  { %v671_v26 = vsel %vm153_vm2, %v668_v45, %v670_v62  ;;  %v674_v27 = vsel %vm153_vm2, %v670_v62, %v664_v31  ;;  %v805_v62 = vld [vmem:[#allocation6 + $0x6] ss:$8 sm:$0xf] }
 0x243   :  { %v697_v38 = vmul.f32 %v680_v5, %v674_v27  ;;  %v700_v39 = vmul.f32 %v692_v12, %v671_v26  ;;  %v810_v63 = vrot.slane %v805_v62, %v1360_v14  ;;  %v814_v5 = vrot.slane %v805_v62, %v1357_v11 }
 0x244   :  { %v818_v12 = vrot.slane %v805_v62, %v1362_v15 }
 0x245   :  { %v752_v8 = vpop.permute.xlu0 %751  ;;  %v708_v9 = vpop.permute.xlu1 %707 }
 0x246   :  { %v715_v18 = vsel %vm197_vm3, %v706_v57, %v708_v9  ;;  %v714_v22 = vsel %vm197_vm3, %v708_v9, %v710_v2 }
 0x247   :  { %v740_v23 = vmul.f32 %v726_v1, %v715_v18  ;;  %v741_v34 = vmul.f32 %v730_v13, %v714_v22  ;;  %v822_v13 = vrot.slane %v805_v62, %v1364_v16 }
 0x249   :  { %v756_v29 = vpop.permute.xlu0 %755  ;;  %v712_v30 = vpop.permute.xlu1 %711  ;;  %v960_v32 = vpack.c.bf16 %v740_v23, %v698_v21  ;;  %v961_v46 = vpack.c.bf16 %v741_v34, %v699_v41 }
 0x24a   :  { %v713_v35 = vsel %vm197_vm3, %v710_v2, %v712_v30  ;;  %v716_v36 = vsel %vm197_vm3, %v712_v30, %v706_v57 }
 0x24b   :  { %v739_v31 = vmul.f32 %v722_v19, %v716_v36  ;;  %v742_v40 = vmul.f32 %v734_v24, %v713_v35  ;;  %998 = vmatprep.subr.bf16.mxu0 %v960_v32 }
 0x24d   :  { %v959_v42 = vpack.c.bf16 %v739_v31, %v697_v38  ;;  %v794_v43 = vpop.permute.xlu0 %793  ;;  %v754_v44 = vpop.permute.xlu1 %753  ;;  %v962_v45 = vpack.c.bf16 %v742_v40, %v700_v39  ;;  %v898_v38 = vrot.slane %v889_v28, %v1357_v11 }
 0x24e   :  { %v760_v47 = vsel %vm245_vm4, %v754_v44, %v756_v29  ;;  %v761_v48 = vsel %vm245_vm4, %v752_v8, %v754_v44 }
 0x24f   :  { %v785_v50 = vmul.f32 %v768_v33, %v761_v48  ;;  %v786_v51 = vmul.f32 %v772_v37, %v760_v47  ;;  %999 = vmatpush1.bf16.msra.mxu0 %v959_v42  ;;  %1039 = vmatprep.subr.bf16.mxu1 %v962_v45  ;;  %v894_v37 = vrot.slane %v889_v28, %v1360_v14 }
 0x250   :  { %1040 = vmatpush1.bf16.msra.mxu1 %v961_v46 }
 0x251   :  { %v963_v53 = vpack.c.bf16 %v785_v50, %v1484_v6  ;;  %v798_v54 = vpop.permute.xlu0 %797  ;;  %v758_v55 = vpop.permute.xlu1 %757  ;;  %v964_v56 = vpack.c.bf16 %v786_v51, %v1492_v4  ;;  %v847_v4 = vld [vmem:[#allocation6 + $0x7] ss:$8 sm:$0xf] }
 0x252   :  { %v759_v57 = vsel %vm245_vm4, %v756_v29, %v758_v55  ;;  %v762_v58 = vsel %vm245_vm4, %v758_v55, %v752_v8  ;;  %v852_v8 = vrot.slane %v847_v4, %v1360_v14  ;;  %v856_v9 = vrot.slane %v847_v4, %v1357_v11 }
 0x253   :  { %v787_v59 = vmul.f32 %v776_v49, %v759_v57  ;;  %v788_v60 = vmul.f32 %v780_v52, %v762_v58  ;;  %1000 = vmatprep.subr.bf16.mxu0 %v964_v56  ;;  %v860_v21 = vrot.slane %v847_v4, %v1362_v15  ;;  %v864_v22 = vrot.slane %v847_v4, %v1364_v16 }
 0x254   :  { %1001 = vmatpush1.bf16.msra.mxu0 %v963_v53  ;;  %v902_v11 = vrot.slane %v889_v28, %v1362_v15  ;;  %v906_v49 = vrot.slane %v889_v28, %v1364_v16  ;;  %v578_v15 = vld [vmem:[%s1683_s3] sm:$0xf]  ;;  %s1210_s3 = smov [#allocation8]  }
 0x255   :  { %v965_v61 = vpack.c.bf16 %v787_v59, %v1486_v7  ;;  %v836_v3 = vpop.permute.xlu0 %835  ;;  %v796_v2 = vpop.permute.xlu1 %795  ;;  %v966_v6 = vpack.c.bf16 %v788_v60, %v1498_v17  ;;  %s1092_s10 = sshll.u32 %s1210_s3, 4  ;;  %s1093_s10 = int_to_ptr.vmem [resolvable:$true] %s1092_s10 }
 0x256   :  { %v802_v7 = vsel %vm289_vm6, %v796_v2, %v798_v54  ;;  %v803_v17 = vsel %vm289_vm6, %v794_v43, %v796_v2  ;;  %s1169_s11 = scalar_lea.vmem %s1093_s10, 512  ;;  %p1174_p3 = scmp.lt.s32.totalorder %s1093_s10, %s1093_s10 }
 0x257   :  { %1041 = vmatprep.subr.bf16.mxu1 %v966_v6  ;;  %v827_v23 = vmul.f32 %v810_v63, %v803_v17  ;;  %v828_v24 = vmul.f32 %v814_v5, %v802_v7  ;;  %p1170_p2 = scmp.ne.s32.totalorder %s1093_s10, %s1169_s11  ;;  %p1175_p4 = scmp.lt.s32.totalorder %s1169_s11, %s1169_s11 }
 0x258   :  { %1042 = vmatpush1.bf16.msra.mxu1 %v965_v61 }
 0x259   :  { %v840_v0 = vpop.permute.xlu0 %839  ;;  %v800_v1 = vpop.permute.xlu1 %799  ;;  %p1176_p5 = por %p1175_p4, %p1174_p3 }
 0x25a   :  { %v801_v29 = vsel %vm289_vm6, %v798_v54, %v800_v1  ;;  %v804_v30 = vsel %vm289_vm6, %v800_v1, %v794_v43 }
 0x25b   :  { %v829_v39 = vmul.f32 %v818_v12, %v801_v29  ;;  %v830_v31 = vmul.f32 %v822_v13, %v804_v30  ;;  %p1177_p6 = pnand %p1176_p5, %p1170_p2 }
 0x25d   :  { %v838_v18 = vpop.permute.xlu1 %837  ;;  %v878_v25 = vpop.permute.xlu0 %877 }
 0x25e   :  { %v844_v19 = vsel %vm333_vm5, %v838_v18, %v840_v0  ;;  %v845_v20 = vsel %vm333_vm5, %v836_v3, %v838_v18 }
 0x25f   :  { %v869_v26 = vmul.f32 %v852_v8, %v845_v20  ;;  %v870_v27 = vmul.f32 %v856_v9, %v844_v19 }
 0x261   :  { %v967_v32 = vpack.c.bf16 %v869_v26, %v827_v23  ;;  %v842_v33 = vpop.permute.xlu1 %841  ;;  %v968_v34 = vpack.c.bf16 %v870_v27, %v828_v24  ;;  %v882_v42 = vpop.permute.xlu0 %881 }
 0x262   :  { %v843_v35 = vsel %vm333_vm5, %v840_v0, %v842_v33  ;;  %v846_v36 = vsel %vm333_vm5, %v842_v33, %v836_v3 }
 0x263   :  { %v871_v40 = vmul.f32 %v860_v21, %v843_v35  ;;  %v872_v41 = vmul.f32 %v864_v22, %v846_v36  ;;  %1002 = vmatprep.subr.bf16.mxu0 %v968_v34 }
 0x264   :  { %1003 = vmatpush1.bf16.msra.mxu0 %v967_v32 }
 0x265   :  { %v969_v43 = vpack.c.bf16 %v871_v40, %v829_v39  ;;  %v880_v44 = vpop.permute.xlu1 %879  ;;  %v970_v45 = vpack.c.bf16 %v872_v41, %v830_v31 }
 0x266   :  { %v886_v46 = vsel %vm377_vm7, %v880_v44, %v882_v42  ;;  %v887_v47 = vsel %vm377_vm7, %v878_v25, %v880_v44 }
 0x267   :  { %v911_v48 = vmul.f32 %v894_v37, %v887_v47  ;;  %v912_v14 = vmul.f32 %v898_v38, %v886_v46  ;;  %1043 = vmatprep.subr.bf16.mxu1 %v970_v45 }
 0x268   :  { %1044 = vmatpush1.bf16.msra.mxu1 %v969_v43 }
 0x269   :  { %v971_v50 = vpack.c.bf16 %v911_v48, %v911_v48  ;;  %v972_v51 = vpack.c.bf16 %v912_v14, %v912_v14  ;;  %v884_v52 = vpop.permute.xlu1 %883 }
 0x26a   :  { %v885_v53 = vsel %vm377_vm7, %v882_v42, %v884_v52  ;;  %v888_v54 = vsel %vm377_vm7, %v884_v52, %v878_v25 }
 0x26b   :  { %v913_v55 = vmul.f32 %v902_v11, %v885_v53  ;;  %v914_v56 = vmul.f32 %v906_v49, %v888_v54  ;;  %1106 = vmatprep.subr.msk.bf16.mxu0 %vm479_vm8, %v972_v51  ;;  %v985_v57 = vsel %vm479_vm8, %v971_v50, 0 }
 0x26c   :  { %1005 = vmatpush1.bf16.msra.mxu0 %v985_v57 }
 0x26d   :  { %v973_v16 = vpack.c.bf16 %v913_v55, %v913_v55  ;;  %v974_v58 = vpack.c.bf16 %v914_v56, %v914_v56 }
 0x26f   :  { %1107 = vmatmul.mubr.msk.bf16.vlgmr.msra.gmra.mrb[4].mxu0 %vm475_vm9, %v578_v15  ;;  %1108 = vmatprep.subr.msk.bf16.mxu1 %vm479_vm8, %v974_v58  ;;  %v991_v10 = vsel %vm479_vm8, %v973_v16, 0 }
 0x270   :  { %1046 = vmatpush1.bf16.msra.mxu1 %v991_v10 }
 0x272   :  { %v979_v59 = vpop.permute.xlu0 %978 }
 0x273   :  { %1109 = vmatmul.mubr.msk.bf16.vlgmr.msra.gmra.mrb[4].mxu1 %vm475_vm9, %v578_v15 }
 0x342   :  { %v1030_v60 = vpop.f32.mrb[4].mxu0 }
 0x343   :  { %v1031_v61 = vadd.f32 %v1030_v60, %v979_v59  ;;  %v1032_v3 = vpop.f32.mrb[5].mxu0 }
 0x344   :  { %v1033_v2 = vadd.f32 %v1032_v3, %v979_v59  ;;  %v1034_v6 = vpop.f32.mrb[6].mxu0 }
 0x345   :  { %v1078_v62 = vmax.f32 %v1031_v61, 0.0  ;;  %v1035_v4 = vpop.f32.mrb[7].mxu0 }
 0x346   :  { %v1079_v0 = vmax.f32 %v1033_v2, 0.0  ;;  %v1071_v1 = vpop.f32.mrb[4].mxu1 }
 0x347   :  { %1082 = vst [vmem:[#allocation8] sm:$0xff] %v1078_v62  ;;  %v1072_v63 = vadd.f32 %v1071_v1, %v979_v59  ;;  %v1073_v5 = vpop.f32.mrb[5].mxu1 }
 0x348   :  { %1083 = vst [vmem:[#allocation8 + $0x8] sm:$0xff] %v1079_v0  ;;  %v1074_v8 = vadd.f32 %v1073_v5, %v979_v59  ;;  %v1075_v9 = vpop.f32.mrb[6].mxu1 }
 0x349   :  { %v1080_v7 = vmax.f32 %v1072_v63, 0.0  ;;  %v1076_v17 = vpop.f32.mrb[7].mxu1 }
 0x34a   :  { %v1081_v12 = vmax.f32 %v1074_v8, 0.0 }
 0x34b   :  { %1084 = vst [vmem:[#allocation8 + $0x10] sm:$0xff] %v1080_v7 }
 0x34c   :  { %1085 = vst [vmem:[#allocation8 + $0x18] sm:$0xff] %v1081_v12 }
 0x34d   :  { %1180 = shalt.err (!%p1177_p6)
}
 0x34e   :  { %s1181_s14 = scalar_lea.hbm %s1686_s6, 512 }
 0x34f   :  { %p1182_p7 = scmp.ne.s32.totalorder %s1686_s6, %s1181_s14  ;;  %p1185_p8 = scmp.lt.u32.totalorder %s1181_s14, %s1686_s6 }
 0x351   :  { %p1187_p9 = pnand %p1185_p8, %p1182_p7 }
 0x353   :  { %1190 = shalt.err (!%p1187_p9)
}
 0x354   :  { %1095 = dma.vmem_to_hbm [thread:$0]  %s1093_s10, 512, %s1686_s6, [#allocation5]  }
 0x355   :  { %1195 = dma.done.wait [#allocation5], 512  }
 0x356   :  { %1196 = vsyncadd [#allocation5], 4294966784 }
 0x357   :  { %1099 = vsyncpa [#allocation4], 1 }
 0x358   :  { %1100 = vsyncpa [#allocation7], 1 }
 0x359   :  { %1101 = vsyncpa [#allocation5], 1 }

</bundles_post_ra>
